<compile_context>
chip_gen: v5e
topology: v5e:2x2
jax: 0.10.0
libtpu: 0.0.40
codegen_flags: <defaults>
</compile_context>

<pallas_src>
import jax
import jax.numpy as jnp
from jax.experimental import pallas as pl
from jax.experimental.pallas import tpu as pltpu


def _ceil_to(x, m):
    return ((x + m - 1) // m) * m


def adapter_block_kernel(x_ref, wm_ref, wd_ref, wu_ref, bd_ref, bc_ref, o_ref):
    """One (C, TILE_P) pixel tile.

    x_ref, o_ref : VMEM (C, TILE_P) float32  -- channels on sublanes, pixels on lanes
    wm_ref       : SMEM (C*C,)      flat main-conv weight,   wm[o, c] at o*C + c
    wd_ref       : SMEM (Cmid*C,)   flat down-proj weight,   wd[m, c] at m*C + c
    wu_ref       : SMEM (C*Cmid,)   flat up-proj weight,     wu[o, m] at o*Cmid + m
    bd_ref       : SMEM (Cmid,)     down-proj bias
    bc_ref       : SMEM (C,)        combined bias  (bm + bu)
    """
    C = x_ref.shape[0]
    Cmid = bd_ref.shape[0]

    # ---- adapter down-projection + ReLU (VPU: scalar-from-SMEM broadcast FMAs)
    h = []
    for m in range(Cmid):
        acc = wd_ref[m * C] * x_ref[0:1, :]
        for c in range(1, C):
            acc = acc + wd_ref[m * C + c] * x_ref[c:c + 1, :]
        h.append(jnp.maximum(acc + bd_ref[m], 0.0))

    # ---- main 1x1 conv + adapter up-projection + combined bias, per out channel
    for o in range(C):
        acc = wm_ref[o * C] * x_ref[0:1, :]
        for c in range(1, C):
            acc = acc + wm_ref[o * C + c] * x_ref[c:c + 1, :]
        for m in range(Cmid):
            acc = acc + wu_ref[o * Cmid + m] * h[m]
        o_ref[o:o + 1, :] = (acc + bc_ref[o]).astype(o_ref.dtype)


def base_adapter_block(x_nchw, wm, bm, wd, bd, wu, bu, *, tile_pix=2048):
    """x_nchw: (N, C, H, W) float32; wm: (C, C); wd: (Cmid, C); wu: (C, Cmid).

    Returns (N, C, H, W) = conv1x1(x; wm, bm) + conv1x1(relu(conv1x1(x; wd, bd)); wu, bu)
    """
    N, C, H, W = x_nchw.shape
    Cmid = wd.shape[0]
    assert wm.shape == (C, C) and wd.shape == (Cmid, C) and wu.shape == (C, Cmid)
    # Unrolled VPU path is intended for small channel counts (adapter blocks);
    # for C >= 128 a jnp.dot (MXU) formulation of W @ X should be used instead.
    assert C <= 32 and Cmid <= 32, "use an MXU (jnp.dot) path for large C"

    P = H * W
    x3 = x_nchw.reshape(N, C, P)                     # pure reshape, no transpose

    # pixel tile: multiple of 128 lanes, clipped to the (lane-padded) pixel count
    tile_p = min(_ceil_to(tile_pix, 128), _ceil_to(P, 128))
    P_pad = _ceil_to(P, tile_p)
    if P_pad != P:                                    # ragged spatial sizes: pad lanes
        x3 = jnp.pad(x3, ((0, 0), (0, 0), (0, P_pad - P)))

    f32 = jnp.float32
    wm_flat = wm.astype(f32).reshape(-1)              # [o*C + c]
    wd_flat = wd.astype(f32).reshape(-1)              # [m*C + c]
    wu_flat = wu.astype(f32).reshape(-1)              # [o*Cmid + m]
    bd_f = bd.astype(f32)
    bc_f = (bm + bu).astype(f32)                      # folded main + up-proj bias

    grid = (N, P_pad // tile_p)
    smem_spec = pl.BlockSpec(memory_space=pltpu.MemorySpace.SMEM)

    out3 = pl.pallas_call(
        adapter_block_kernel,
        out_shape=jax.ShapeDtypeStruct((N, C, P_pad), x3.dtype),
        grid_spec=pltpu.PrefetchScalarGridSpec(
            num_scalar_prefetch=0,
            grid=grid,
            in_specs=[
                # (batch squeezed, full channel axis, lane-dense pixel tile)
                pl.BlockSpec((None, C, tile_p), lambda n, t: (n, 0, t)),
                smem_spec,   # wm_flat
                smem_spec,   # wd_flat
                smem_spec,   # wu_flat
                smem_spec,   # bd
                smem_spec,   # bc = bm + bu
            ],
            out_specs=pl.BlockSpec((None, C, tile_p), lambda n, t: (n, 0, t)),
        ),
        compiler_params=pltpu.CompilerParams(
            dimension_semantics=("parallel", "parallel")),
    )(x3, wm_flat, wd_flat, wu_flat, bd_f, bc_f)

    return out3[:, :, :P].reshape(N, C, H, W)


def _reference(x, wm, bm, wd, bd, wu, bu):
    # pure-JAX reference of the same math (1x1 convs as channel contractions)
    main = jnp.einsum('oc,nchw->nohw', wm, x) + bm[None, :, None, None]
    hid = jnp.maximum(
        jnp.einsum('mc,nchw->nmhw', wd, x) + bd[None, :, None, None], 0.0)
    adp = jnp.einsum('om,nmhw->nohw', wu, hid) + bu[None, :, None, None]
    return main + adp


if __name__ == "__main__":
    key = jax.random.PRNGKey(0)
    N, C, H, W = 2, 4, 16, 16
    Cmid = C // 2

    ks = jax.random.split(key, 7)
    x = jax.random.normal(ks[0], (N, C, H, W), dtype=jnp.float32)

    # deterministic synthetic parameters (no checkpoint load)
    wm = jax.random.normal(ks[1], (C, C), dtype=jnp.float32) * 0.1      # main 1x1
    bm = jax.random.normal(ks[2], (C,), dtype=jnp.float32) * 0.1
    wd = jax.random.normal(ks[3], (Cmid, C), dtype=jnp.float32) * 0.1   # down-proj
    bd = jax.random.normal(ks[4], (Cmid,), dtype=jnp.float32) * 0.1
    wu = jax.random.normal(ks[5], (C, Cmid), dtype=jnp.float32) * 0.1   # up-proj
    bu = jax.random.normal(ks[6], (C,), dtype=jnp.float32) * 0.1

    out = base_adapter_block(x, wm, bm, wd, bd, wu, bu)
    out = jax.block_until_ready(out)

    ref = _reference(x, wm, bm, wd, bd, wu, bu)
    assert out.shape == (N, C, H, W)
    assert jnp.allclose(out, ref, atol=1e-5, rtol=1e-5), "mismatch vs reference"

    print("KERNEL_OK")
</pallas_src>

<mosaic_0001>
module attributes {stable_mosaic.version = 11 : i64} {
  func.func @adapter_block_kernel(%arg0: i32, %arg1: i32, %arg2: memref<1x4x256xf32, #tpu.memory_space<vmem>>, %arg3: memref<16xf32, #tpu.memory_space<smem>>, %arg4: memref<8xf32, #tpu.memory_space<smem>>, %arg5: memref<8xf32, #tpu.memory_space<smem>>, %arg6: memref<2xf32, #tpu.memory_space<smem>>, %arg7: memref<4xf32, #tpu.memory_space<smem>>, %arg8: memref<1x4x256xf32, #tpu.memory_space<vmem>>) attributes {dimension_semantics = [#tpu.dimension_semantics<parallel>, #tpu.dimension_semantics<parallel>], iteration_bounds = array<i64: 2, 1>, scalar_prefetch = 0 : i64, scratch_operands = 0 : i64, tpu.core_type = #tpu.core_type<tc>, window_params = [{transform_indices = @transform_0, window_bounds = array<i64: 1, 4, 256>}, {transform_indices = @transform_1, window_bounds = array<i64: 16>}, {transform_indices = @transform_2, window_bounds = array<i64: 8>}, {transform_indices = @transform_3, window_bounds = array<i64: 8>}, {transform_indices = @transform_4, window_bounds = array<i64: 2>}, {transform_indices = @transform_5, window_bounds = array<i64: 4>}, {transform_indices = @transform_6, window_bounds = array<i64: 1, 4, 256>}]} {
    %c0 = arith.constant 0 : index
    %0 = memref.load %arg4[%c0] : memref<8xf32, #tpu.memory_space<smem>>
    %c0_0 = arith.constant 0 : index
    %c0_1 = arith.constant 0 : index
    %c0_2 = arith.constant 0 : index
    %1 = vector.load %arg2[%c0_0, %c0_1, %c0_2] : memref<1x4x256xf32, #tpu.memory_space<vmem>>, vector<1x1x256xf32>
    %2 = vector.shape_cast %1 : vector<1x1x256xf32> to vector<1x256xf32>
    %3 = vector.broadcast %0 : f32 to vector<1x256xf32>
    %4 = arith.mulf %3, %2 : vector<1x256xf32>
    %c1 = arith.constant 1 : index
    %5 = memref.load %arg4[%c1] : memref<8xf32, #tpu.memory_space<smem>>
    %c0_3 = arith.constant 0 : index
    %c1_4 = arith.constant 1 : index
    %c0_5 = arith.constant 0 : index
    %6 = vector.load %arg2[%c0_3, %c1_4, %c0_5] : memref<1x4x256xf32, #tpu.memory_space<vmem>>, vector<1x1x256xf32>
    %7 = vector.shape_cast %6 : vector<1x1x256xf32> to vector<1x256xf32>
    %8 = vector.broadcast %5 : f32 to vector<1x256xf32>
    %9 = arith.mulf %8, %7 : vector<1x256xf32>
    %10 = arith.addf %4, %9 : vector<1x256xf32>
    %c2 = arith.constant 2 : index
    %11 = memref.load %arg4[%c2] : memref<8xf32, #tpu.memory_space<smem>>
    %c0_6 = arith.constant 0 : index
    %c2_7 = arith.constant 2 : index
    %c0_8 = arith.constant 0 : index
    %12 = vector.load %arg2[%c0_6, %c2_7, %c0_8] : memref<1x4x256xf32, #tpu.memory_space<vmem>>, vector<1x1x256xf32>
    %13 = vector.shape_cast %12 : vector<1x1x256xf32> to vector<1x256xf32>
    %14 = vector.broadcast %11 : f32 to vector<1x256xf32>
    %15 = arith.mulf %14, %13 : vector<1x256xf32>
    %16 = arith.addf %10, %15 : vector<1x256xf32>
    %c3 = arith.constant 3 : index
    %17 = memref.load %arg4[%c3] : memref<8xf32, #tpu.memory_space<smem>>
    %c0_9 = arith.constant 0 : index
    %c3_10 = arith.constant 3 : index
    %c0_11 = arith.constant 0 : index
    %18 = vector.load %arg2[%c0_9, %c3_10, %c0_11] : memref<1x4x256xf32, #tpu.memory_space<vmem>>, vector<1x1x256xf32>
    %19 = vector.shape_cast %18 : vector<1x1x256xf32> to vector<1x256xf32>
    %20 = vector.broadcast %17 : f32 to vector<1x256xf32>
    %21 = arith.mulf %20, %19 : vector<1x256xf32>
    %22 = arith.addf %16, %21 : vector<1x256xf32>
    %c0_12 = arith.constant 0 : index
    %23 = memref.load %arg6[%c0_12] : memref<2xf32, #tpu.memory_space<smem>>
    %24 = vector.broadcast %23 : f32 to vector<1x256xf32>
    %25 = arith.addf %22, %24 : vector<1x256xf32>
    %cst = arith.constant 0.000000e+00 : f32
    %26 = vector.broadcast %cst : f32 to vector<1x256xf32>
    %27 = arith.maximumf %25, %26 : vector<1x256xf32>
    %c4 = arith.constant 4 : index
    %28 = memref.load %arg4[%c4] : memref<8xf32, #tpu.memory_space<smem>>
    %c0_13 = arith.constant 0 : index
    %c0_14 = arith.constant 0 : index
    %c0_15 = arith.constant 0 : index
    %29 = vector.load %arg2[%c0_13, %c0_14, %c0_15] : memref<1x4x256xf32, #tpu.memory_space<vmem>>, vector<1x1x256xf32>
    %30 = vector.shape_cast %29 : vector<1x1x256xf32> to vector<1x256xf32>
    %31 = vector.broadcast %28 : f32 to vector<1x256xf32>
    %32 = arith.mulf %31, %30 : vector<1x256xf32>
    %c5 = arith.constant 5 : index
    %33 = memref.load %arg4[%c5] : memref<8xf32, #tpu.memory_space<smem>>
    %c0_16 = arith.constant 0 : index
    %c1_17 = arith.constant 1 : index
    %c0_18 = arith.constant 0 : index
    %34 = vector.load %arg2[%c0_16, %c1_17, %c0_18] : memref<1x4x256xf32, #tpu.memory_space<vmem>>, vector<1x1x256xf32>
    %35 = vector.shape_cast %34 : vector<1x1x256xf32> to vector<1x256xf32>
    %36 = vector.broadcast %33 : f32 to vector<1x256xf32>
    %37 = arith.mulf %36, %35 : vector<1x256xf32>
    %38 = arith.addf %32, %37 : vector<1x256xf32>
    %c6 = arith.constant 6 : index
    %39 = memref.load %arg4[%c6] : memref<8xf32, #tpu.memory_space<smem>>
    %c0_19 = arith.constant 0 : index
    %c2_20 = arith.constant 2 : index
    %c0_21 = arith.constant 0 : index
    %40 = vector.load %arg2[%c0_19, %c2_20, %c0_21] : memref<1x4x256xf32, #tpu.memory_space<vmem>>, vector<1x1x256xf32>
    %41 = vector.shape_cast %40 : vector<1x1x256xf32> to vector<1x256xf32>
    %42 = vector.broadcast %39 : f32 to vector<1x256xf32>
    %43 = arith.mulf %42, %41 : vector<1x256xf32>
    %44 = arith.addf %38, %43 : vector<1x256xf32>
    %c7 = arith.constant 7 : index
    %45 = memref.load %arg4[%c7] : memref<8xf32, #tpu.memory_space<smem>>
    %c0_22 = arith.constant 0 : index
    %c3_23 = arith.constant 3 : index
    %c0_24 = arith.constant 0 : index
    %46 = vector.load %arg2[%c0_22, %c3_23, %c0_24] : memref<1x4x256xf32, #tpu.memory_space<vmem>>, vector<1x1x256xf32>
    %47 = vector.shape_cast %46 : vector<1x1x256xf32> to vector<1x256xf32>
    %48 = vector.broadcast %45 : f32 to vector<1x256xf32>
    %49 = arith.mulf %48, %47 : vector<1x256xf32>
    %50 = arith.addf %44, %49 : vector<1x256xf32>
    %c1_25 = arith.constant 1 : index
    %51 = memref.load %arg6[%c1_25] : memref<2xf32, #tpu.memory_space<smem>>
    %52 = vector.broadcast %51 : f32 to vector<1x256xf32>
    %53 = arith.addf %50, %52 : vector<1x256xf32>
    %cst_26 = arith.constant 0.000000e+00 : f32
    %54 = vector.broadcast %cst_26 : f32 to vector<1x256xf32>
    %55 = arith.maximumf %53, %54 : vector<1x256xf32>
    %c0_27 = arith.constant 0 : index
    %56 = memref.load %arg3[%c0_27] : memref<16xf32, #tpu.memory_space<smem>>
    %c0_28 = arith.constant 0 : index
    %c0_29 = arith.constant 0 : index
    %c0_30 = arith.constant 0 : index
    %57 = vector.load %arg2[%c0_28, %c0_29, %c0_30] : memref<1x4x256xf32, #tpu.memory_space<vmem>>, vector<1x1x256xf32>
    %58 = vector.shape_cast %57 : vector<1x1x256xf32> to vector<1x256xf32>
    %59 = vector.broadcast %56 : f32 to vector<1x256xf32>
    %60 = arith.mulf %59, %58 : vector<1x256xf32>
    %c1_31 = arith.constant 1 : index
    %61 = memref.load %arg3[%c1_31] : memref<16xf32, #tpu.memory_space<smem>>
    %c0_32 = arith.constant 0 : index
    %c1_33 = arith.constant 1 : index
    %c0_34 = arith.constant 0 : index
    %62 = vector.load %arg2[%c0_32, %c1_33, %c0_34] : memref<1x4x256xf32, #tpu.memory_space<vmem>>, vector<1x1x256xf32>
    %63 = vector.shape_cast %62 : vector<1x1x256xf32> to vector<1x256xf32>
    %64 = vector.broadcast %61 : f32 to vector<1x256xf32>
    %65 = arith.mulf %64, %63 : vector<1x256xf32>
    %66 = arith.addf %60, %65 : vector<1x256xf32>
    %c2_35 = arith.constant 2 : index
    %67 = memref.load %arg3[%c2_35] : memref<16xf32, #tpu.memory_space<smem>>
    %c0_36 = arith.constant 0 : index
    %c2_37 = arith.constant 2 : index
    %c0_38 = arith.constant 0 : index
    %68 = vector.load %arg2[%c0_36, %c2_37, %c0_38] : memref<1x4x256xf32, #tpu.memory_space<vmem>>, vector<1x1x256xf32>
    %69 = vector.shape_cast %68 : vector<1x1x256xf32> to vector<1x256xf32>
    %70 = vector.broadcast %67 : f32 to vector<1x256xf32>
    %71 = arith.mulf %70, %69 : vector<1x256xf32>
    %72 = arith.addf %66, %71 : vector<1x256xf32>
    %c3_39 = arith.constant 3 : index
    %73 = memref.load %arg3[%c3_39] : memref<16xf32, #tpu.memory_space<smem>>
    %c0_40 = arith.constant 0 : index
    %c3_41 = arith.constant 3 : index
    %c0_42 = arith.constant 0 : index
    %74 = vector.load %arg2[%c0_40, %c3_41, %c0_42] : memref<1x4x256xf32, #tpu.memory_space<vmem>>, vector<1x1x256xf32>
    %75 = vector.shape_cast %74 : vector<1x1x256xf32> to vector<1x256xf32>
    %76 = vector.broadcast %73 : f32 to vector<1x256xf32>
    %77 = arith.mulf %76, %75 : vector<1x256xf32>
    %78 = arith.addf %72, %77 : vector<1x256xf32>
    %c0_43 = arith.constant 0 : index
    %79 = memref.load %arg5[%c0_43] : memref<8xf32, #tpu.memory_space<smem>>
    %80 = vector.broadcast %79 : f32 to vector<1x256xf32>
    %81 = arith.mulf %80, %27 : vector<1x256xf32>
    %82 = arith.addf %78, %81 : vector<1x256xf32>
    %c1_44 = arith.constant 1 : index
    %83 = memref.load %arg5[%c1_44] : memref<8xf32, #tpu.memory_space<smem>>
    %84 = vector.broadcast %83 : f32 to vector<1x256xf32>
    %85 = arith.mulf %84, %55 : vector<1x256xf32>
    %86 = arith.addf %82, %85 : vector<1x256xf32>
    %c0_45 = arith.constant 0 : index
    %87 = memref.load %arg7[%c0_45] : memref<4xf32, #tpu.memory_space<smem>>
    %88 = vector.broadcast %87 : f32 to vector<1x256xf32>
    %89 = arith.addf %86, %88 : vector<1x256xf32>
    %c0_46 = arith.constant 0 : index
    %c0_47 = arith.constant 0 : index
    %c0_48 = arith.constant 0 : index
    %90 = vector.load %arg8[%c0_46, %c0_47, %c0_48] : memref<1x4x256xf32, #tpu.memory_space<vmem>>, vector<1x1x256xf32>
    %91 = vector.shape_cast %90 : vector<1x1x256xf32> to vector<1x256xf32>
    %92 = vector.shape_cast %89 : vector<1x256xf32> to vector<1x1x256xf32>
    tpu.vector_store %arg8[%c0_46, %c0_47, %c0_48], %92 {strides = array<i32>} : memref<1x4x256xf32, #tpu.memory_space<vmem>>, vector<1x1x256xf32>,
    %c4_49 = arith.constant 4 : index
    %93 = memref.load %arg3[%c4_49] : memref<16xf32, #tpu.memory_space<smem>>
    %c0_50 = arith.constant 0 : index
    %c0_51 = arith.constant 0 : index
    %c0_52 = arith.constant 0 : index
    %94 = vector.load %arg2[%c0_50, %c0_51, %c0_52] : memref<1x4x256xf32, #tpu.memory_space<vmem>>, vector<1x1x256xf32>
    %95 = vector.shape_cast %94 : vector<1x1x256xf32> to vector<1x256xf32>
    %96 = vector.broadcast %93 : f32 to vector<1x256xf32>
    %97 = arith.mulf %96, %95 : vector<1x256xf32>
    %c5_53 = arith.constant 5 : index
    %98 = memref.load %arg3[%c5_53] : memref<16xf32, #tpu.memory_space<smem>>
    %c0_54 = arith.constant 0 : index
    %c1_55 = arith.constant 1 : index
    %c0_56 = arith.constant 0 : index
    %99 = vector.load %arg2[%c0_54, %c1_55, %c0_56] : memref<1x4x256xf32, #tpu.memory_space<vmem>>, vector<1x1x256xf32>
    %100 = vector.shape_cast %99 : vector<1x1x256xf32> to vector<1x256xf32>
    %101 = vector.broadcast %98 : f32 to vector<1x256xf32>
    %102 = arith.mulf %101, %100 : vector<1x256xf32>
    %103 = arith.addf %97, %102 : vector<1x256xf32>
    %c6_57 = arith.constant 6 : index
    %104 = memref.load %arg3[%c6_57] : memref<16xf32, #tpu.memory_space<smem>>
    %c0_58 = arith.constant 0 : index
    %c2_59 = arith.constant 2 : index
    %c0_60 = arith.constant 0 : index
    %105 = vector.load %arg2[%c0_58, %c2_59, %c0_60] : memref<1x4x256xf32, #tpu.memory_space<vmem>>, vector<1x1x256xf32>
    %106 = vector.shape_cast %105 : vector<1x1x256xf32> to vector<1x256xf32>
    %107 = vector.broadcast %104 : f32 to vector<1x256xf32>
    %108 = arith.mulf %107, %106 : vector<1x256xf32>
    %109 = arith.addf %103, %108 : vector<1x256xf32>
    %c7_61 = arith.constant 7 : index
    %110 = memref.load %arg3[%c7_61] : memref<16xf32, #tpu.memory_space<smem>>
    %c0_62 = arith.constant 0 : index
    %c3_63 = arith.constant 3 : index
    %c0_64 = arith.constant 0 : index
    %111 = vector.load %arg2[%c0_62, %c3_63, %c0_64] : memref<1x4x256xf32, #tpu.memory_space<vmem>>, vector<1x1x256xf32>
    %112 = vector.shape_cast %111 : vector<1x1x256xf32> to vector<1x256xf32>
    %113 = vector.broadcast %110 : f32 to vector<1x256xf32>
    %114 = arith.mulf %113, %112 : vector<1x256xf32>
    %115 = arith.addf %109, %114 : vector<1x256xf32>
    %c2_65 = arith.constant 2 : index
    %116 = memref.load %arg5[%c2_65] : memref<8xf32, #tpu.memory_space<smem>>
    %117 = vector.broadcast %116 : f32 to vector<1x256xf32>
    %118 = arith.mulf %117, %27 : vector<1x256xf32>
    %119 = arith.addf %115, %118 : vector<1x256xf32>
    %c3_66 = arith.constant 3 : index
    %120 = memref.load %arg5[%c3_66] : memref<8xf32, #tpu.memory_space<smem>>
    %121 = vector.broadcast %120 : f32 to vector<1x256xf32>
    %122 = arith.mulf %121, %55 : vector<1x256xf32>
    %123 = arith.addf %119, %122 : vector<1x256xf32>
    %c1_67 = arith.constant 1 : index
    %124 = memref.load %arg7[%c1_67] : memref<4xf32, #tpu.memory_space<smem>>
    %125 = vector.broadcast %124 : f32 to vector<1x256xf32>
    %126 = arith.addf %123, %125 : vector<1x256xf32>
    %c0_68 = arith.constant 0 : index
    %c1_69 = arith.constant 1 : index
    %c0_70 = arith.constant 0 : index
    %127 = vector.load %arg8[%c0_68, %c1_69, %c0_70] : memref<1x4x256xf32, #tpu.memory_space<vmem>>, vector<1x1x256xf32>
    %128 = vector.shape_cast %127 : vector<1x1x256xf32> to vector<1x256xf32>
    %129 = vector.shape_cast %126 : vector<1x256xf32> to vector<1x1x256xf32>
    tpu.vector_store %arg8[%c0_68, %c1_69, %c0_70], %129 {strides = array<i32>} : memref<1x4x256xf32, #tpu.memory_space<vmem>>, vector<1x1x256xf32>,
    %c8 = arith.constant 8 : index
    %130 = memref.load %arg3[%c8] : memref<16xf32, #tpu.memory_space<smem>>
    %c0_71 = arith.constant 0 : index
    %c0_72 = arith.constant 0 : index
    %c0_73 = arith.constant 0 : index
    %131 = vector.load %arg2[%c0_71, %c0_72, %c0_73] : memref<1x4x256xf32, #tpu.memory_space<vmem>>, vector<1x1x256xf32>
    %132 = vector.shape_cast %131 : vector<1x1x256xf32> to vector<1x256xf32>
    %133 = vector.broadcast %130 : f32 to vector<1x256xf32>
    %134 = arith.mulf %133, %132 : vector<1x256xf32>
    %c9 = arith.constant 9 : index
    %135 = memref.load %arg3[%c9] : memref<16xf32, #tpu.memory_space<smem>>
    %c0_74 = arith.constant 0 : index
    %c1_75 = arith.constant 1 : index
    %c0_76 = arith.constant 0 : index
    %136 = vector.load %arg2[%c0_74, %c1_75, %c0_76] : memref<1x4x256xf32, #tpu.memory_space<vmem>>, vector<1x1x256xf32>
    %137 = vector.shape_cast %136 : vector<1x1x256xf32> to vector<1x256xf32>
    %138 = vector.broadcast %135 : f32 to vector<1x256xf32>
    %139 = arith.mulf %138, %137 : vector<1x256xf32>
    %140 = arith.addf %134, %139 : vector<1x256xf32>
    %c10 = arith.constant 10 : index
    %141 = memref.load %arg3[%c10] : memref<16xf32, #tpu.memory_space<smem>>
    %c0_77 = arith.constant 0 : index
    %c2_78 = arith.constant 2 : index
    %c0_79 = arith.constant 0 : index
    %142 = vector.load %arg2[%c0_77, %c2_78, %c0_79] : memref<1x4x256xf32, #tpu.memory_space<vmem>>, vector<1x1x256xf32>
    %143 = vector.shape_cast %142 : vector<1x1x256xf32> to vector<1x256xf32>
    %144 = vector.broadcast %141 : f32 to vector<1x256xf32>
    %145 = arith.mulf %144, %143 : vector<1x256xf32>
    %146 = arith.addf %140, %145 : vector<1x256xf32>
    %c11 = arith.constant 11 : index
    %147 = memref.load %arg3[%c11] : memref<16xf32, #tpu.memory_space<smem>>
    %c0_80 = arith.constant 0 : index
    %c3_81 = arith.constant 3 : index
    %c0_82 = arith.constant 0 : index
    %148 = vector.load %arg2[%c0_80, %c3_81, %c0_82] : memref<1x4x256xf32, #tpu.memory_space<vmem>>, vector<1x1x256xf32>
    %149 = vector.shape_cast %148 : vector<1x1x256xf32> to vector<1x256xf32>
    %150 = vector.broadcast %147 : f32 to vector<1x256xf32>
    %151 = arith.mulf %150, %149 : vector<1x256xf32>
    %152 = arith.addf %146, %151 : vector<1x256xf32>
    %c4_83 = arith.constant 4 : index
    %153 = memref.load %arg5[%c4_83] : memref<8xf32, #tpu.memory_space<smem>>
    %154 = vector.broadcast %153 : f32 to vector<1x256xf32>
    %155 = arith.mulf %154, %27 : vector<1x256xf32>
    %156 = arith.addf %152, %155 : vector<1x256xf32>
    %c5_84 = arith.constant 5 : index
    %157 = memref.load %arg5[%c5_84] : memref<8xf32, #tpu.memory_space<smem>>
    %158 = vector.broadcast %157 : f32 to vector<1x256xf32>
    %159 = arith.mulf %158, %55 : vector<1x256xf32>
    %160 = arith.addf %156, %159 : vector<1x256xf32>
    %c2_85 = arith.constant 2 : index
    %161 = memref.load %arg7[%c2_85] : memref<4xf32, #tpu.memory_space<smem>>
    %162 = vector.broadcast %161 : f32 to vector<1x256xf32>
    %163 = arith.addf %160, %162 : vector<1x256xf32>
    %c0_86 = arith.constant 0 : index
    %c2_87 = arith.constant 2 : index
    %c0_88 = arith.constant 0 : index
    %164 = vector.load %arg8[%c0_86, %c2_87, %c0_88] : memref<1x4x256xf32, #tpu.memory_space<vmem>>, vector<1x1x256xf32>
    %165 = vector.shape_cast %164 : vector<1x1x256xf32> to vector<1x256xf32>
    %166 = vector.shape_cast %163 : vector<1x256xf32> to vector<1x1x256xf32>
    tpu.vector_store %arg8[%c0_86, %c2_87, %c0_88], %166 {strides = array<i32>} : memref<1x4x256xf32, #tpu.memory_space<vmem>>, vector<1x1x256xf32>,
    %c12 = arith.constant 12 : index
    %167 = memref.load %arg3[%c12] : memref<16xf32, #tpu.memory_space<smem>>
    %c0_89 = arith.constant 0 : index
    %c0_90 = arith.constant 0 : index
    %c0_91 = arith.constant 0 : index
    %168 = vector.load %arg2[%c0_89, %c0_90, %c0_91] : memref<1x4x256xf32, #tpu.memory_space<vmem>>, vector<1x1x256xf32>
    %169 = vector.shape_cast %168 : vector<1x1x256xf32> to vector<1x256xf32>
    %170 = vector.broadcast %167 : f32 to vector<1x256xf32>
    %171 = arith.mulf %170, %169 : vector<1x256xf32>
    %c13 = arith.constant 13 : index
    %172 = memref.load %arg3[%c13] : memref<16xf32, #tpu.memory_space<smem>>
    %c0_92 = arith.constant 0 : index
    %c1_93 = arith.constant 1 : index
    %c0_94 = arith.constant 0 : index
    %173 = vector.load %arg2[%c0_92, %c1_93, %c0_94] : memref<1x4x256xf32, #tpu.memory_space<vmem>>, vector<1x1x256xf32>
    %174 = vector.shape_cast %173 : vector<1x1x256xf32> to vector<1x256xf32>
    %175 = vector.broadcast %172 : f32 to vector<1x256xf32>
    %176 = arith.mulf %175, %174 : vector<1x256xf32>
    %177 = arith.addf %171, %176 : vector<1x256xf32>
    %c14 = arith.constant 14 : index
    %178 = memref.load %arg3[%c14] : memref<16xf32, #tpu.memory_space<smem>>
    %c0_95 = arith.constant 0 : index
    %c2_96 = arith.constant 2 : index
    %c0_97 = arith.constant 0 : index
    %179 = vector.load %arg2[%c0_95, %c2_96, %c0_97] : memref<1x4x256xf32, #tpu.memory_space<vmem>>, vector<1x1x256xf32>
    %180 = vector.shape_cast %179 : vector<1x1x256xf32> to vector<1x256xf32>
    %181 = vector.broadcast %178 : f32 to vector<1x256xf32>
    %182 = arith.mulf %181, %180 : vector<1x256xf32>
    %183 = arith.addf %177, %182 : vector<1x256xf32>
    %c15 = arith.constant 15 : index
    %184 = memref.load %arg3[%c15] : memref<16xf32, #tpu.memory_space<smem>>
    %c0_98 = arith.constant 0 : index
    %c3_99 = arith.constant 3 : index
    %c0_100 = arith.constant 0 : index
    %185 = vector.load %arg2[%c0_98, %c3_99, %c0_100] : memref<1x4x256xf32, #tpu.memory_space<vmem>>, vector<1x1x256xf32>
    %186 = vector.shape_cast %185 : vector<1x1x256xf32> to vector<1x256xf32>
    %187 = vector.broadcast %184 : f32 to vector<1x256xf32>
    %188 = arith.mulf %187, %186 : vector<1x256xf32>
    %189 = arith.addf %183, %188 : vector<1x256xf32>
    %c6_101 = arith.constant 6 : index
    %190 = memref.load %arg5[%c6_101] : memref<8xf32, #tpu.memory_space<smem>>
    %191 = vector.broadcast %190 : f32 to vector<1x256xf32>
    %192 = arith.mulf %191, %27 : vector<1x256xf32>
    %193 = arith.addf %189, %192 : vector<1x256xf32>
    %c7_102 = arith.constant 7 : index
    %194 = memref.load %arg5[%c7_102] : memref<8xf32, #tpu.memory_space<smem>>
    %195 = vector.broadcast %194 : f32 to vector<1x256xf32>
    %196 = arith.mulf %195, %55 : vector<1x256xf32>
    %197 = arith.addf %193, %196 : vector<1x256xf32>
    %c3_103 = arith.constant 3 : index
    %198 = memref.load %arg7[%c3_103] : memref<4xf32, #tpu.memory_space<smem>>
    %199 = vector.broadcast %198 : f32 to vector<1x256xf32>
    %200 = arith.addf %197, %199 : vector<1x256xf32>
    %c0_104 = arith.constant 0 : index
    %c3_105 = arith.constant 3 : index
    %c0_106 = arith.constant 0 : index
    %201 = vector.load %arg8[%c0_104, %c3_105, %c0_106] : memref<1x4x256xf32, #tpu.memory_space<vmem>>, vector<1x1x256xf32>
    %202 = vector.shape_cast %201 : vector<1x1x256xf32> to vector<1x256xf32>
    %203 = vector.shape_cast %200 : vector<1x256xf32> to vector<1x1x256xf32>
    tpu.vector_store %arg8[%c0_104, %c3_105, %c0_106], %203 {strides = array<i32>} : memref<1x4x256xf32, #tpu.memory_space<vmem>>, vector<1x1x256xf32>,
    return
  }
  func.func @transform_0(%arg0: i32, %arg1: i32) -> (i32, i32, i32) {
    %c0_i32 = arith.constant 0 : i32
    %c0_i32_0 = arith.constant 0 : i32
    return %arg0, %c0_i32, %arg1 : i32, i32, i32
  }
  func.func @transform_1(%arg0: i32, %arg1: i32) -> i32 {
    %c0_i32 = arith.constant 0 : i32
    %c0_i32_0 = arith.constant 0 : i32
    return %c0_i32 : i32
  }
  func.func @transform_2(%arg0: i32, %arg1: i32) -> i32 {
    %c0_i32 = arith.constant 0 : i32
    %c0_i32_0 = arith.constant 0 : i32
    return %c0_i32 : i32
  }
  func.func @transform_3(%arg0: i32, %arg1: i32) -> i32 {
    %c0_i32 = arith.constant 0 : i32
    %c0_i32_0 = arith.constant 0 : i32
    return %c0_i32 : i32
  }
  func.func @transform_4(%arg0: i32, %arg1: i32) -> i32 {
    %c0_i32 = arith.constant 0 : i32
    %c0_i32_0 = arith.constant 0 : i32
    return %c0_i32 : i32
  }
  func.func @transform_5(%arg0: i32, %arg1: i32) -> i32 {
    %c0_i32 = arith.constant 0 : i32
    %c0_i32_0 = arith.constant 0 : i32
    return %c0_i32 : i32
  }
  func.func @transform_6(%arg0: i32, %arg1: i32) -> (i32, i32, i32) {
    %c0_i32 = arith.constant 0 : i32
    %c0_i32_0 = arith.constant 0 : i32
    return %arg0, %c0_i32, %arg1 : i32, i32, i32
  }
}

</mosaic_0001>

<bundles_post_ra>
// kernel: tpu_custom_call.1
= control target key start
LH: loop header
LB: loop body
LE: loop exit
PB: predicated region body
PF: predicated region fallthrough
CT: control target
= control target key end

     0   :  { %s1393_s0 = inlined_call_operand.hbm [shape: f32[2,4,256], index: 0, kind: input, shape index: {}]   ;;  %s1394_s1 = inlined_call_operand.hbm [shape: f32[16], index: 1, kind: input, shape index: {}]   ;;  %s1395_s2 = inlined_call_operand.vmem [shape: f32[8], index: 2, kind: input, shape index: {}]   ;;  %s1396_s3 = inlined_call_operand.vmem [shape: f32[8], index: 3, kind: input, shape index: {}]   ;;  %s1397_s4 = inlined_call_operand.vmem [shape: f32[2], index: 4, kind: input, shape index: {}]   ;;  %s1398_s5 = inlined_call_operand.vmem [shape: f32[4], index: 5, kind: input, shape index: {}]   ;;  %s1399_s6 = inlined_call_operand.hbm [shape: f32[2,4,256], index: 6, kind: output, shape index: {}]  }
   0x1   :  { %1400 = sst [smem:[#allocation21_spill]] %s1394_s1 }
   0x2   :  { %11 = vsyncpa [#allocation3], 0 }
   0x3   :  { %13 = vsyncpa [#allocation3 + $0x1], 0 }
   0x4   :  { %14 = vsyncpa [#allocation5], 0 }
   0x5   :  { %15 = vsyncpa [#allocation6], 0 }
   0x6   :  { %16 = vsyncpa [#allocation10], 0 }
   0x7   :  { %17 = vsyncpa [#allocation13], 0 }
   0x8   :  { %18 = vsyncpa [#allocation4], 0 }
   0x9   :  { %20 = vsyncpa [#allocation4 + $0x1], 0  ;;  %s1116_s21 = smov 0   ;;  %s1118_s22 = smov 0  }
   0xa   :  { %s1120_s23 = smov 0   ;;  %s1122_s24 = smov 0  }
   0xb   :  { %s1124_s25 = smov 0   ;;  %s1126_s26 = smov 0  }
   0xc LB: > { %s236_s29 = sshll.u32 %s1396_s3, 4  ;;  %s683_s30 = sadd.s32 4294967295, %s1074_s26   ;;  %s1074_s26 = sphi %s1126_s26, %s26_s26   ;;  %s1070_s25 = sphi %s1124_s25, %s1415_s25   ;;  %s1066_s24 = sphi %s1122_s24, %s1414_s24   ;;  %s1062_s23 = sphi %s1120_s23, %s1413_s23   ;;  %s1058_s22 = sphi %s1118_s22, %s1412_s22   ;;  %s1054_s21 = sphi %s1116_s21, %s1411_s21   ;;  %s237_s29 = int_to_ptr.vmem [resolvable:$true] %s236_s29 }
   0xd   : > { %p685_p0 = scmp.ge.s32.totalorder %s1074_s26, 1  ;;  %p1153_p1 = scmp.eq.s32.totalorder %s683_s30, 0 }
   0xe   : > { %p204_p2 = scmp.lt.s32.totalorder %s1074_s26, 3  ;;  %p691_p4 = scmp.ge.s32.totalorder %s1074_s26, 2 }
   0xf   : > { %s1403_s1 = sld [smem:[#allocation21_spill]]  ;;  %s226_s15 = sshll.u32 %s1395_s2, 4  ;;  %s227_s15 = int_to_ptr.vmem [resolvable:$true] %s226_s15 }
  0x10   : > { %p1158_p3 = pnand %p685_p0, %p204_p2  ;;  %s246_s18 = sshll.u32 %s1397_s4, 4  ;;  %s247_s18 = int_to_ptr.vmem [resolvable:$true] %s246_s18 }
  0x11   : > { %s1076_s19 = smov [#allocation9]   ;;  %s1077_s20 = smov [#allocation7]  }
  0x12   : > { %p782_p5 = pneg %p1158_p3  ;;  %s1078_s27 = smov [#allocation8]  }
  0x13   : > { %s1079_s28 = smov [#allocation11]   ;;  %s1080_s13 = smov [#allocation12]  }
  0x14   : > { %p1170_p6 = pnand %p782_p5, %p1153_p1  ;;  %s38_s14 = sadd.s32 1, %s1070_s25 }
  0x15   : > { %s216_s11 = sshll.u32 %s1403_s1, 4  ;;  %p40_p7 = scmp.ge.s32.totalorder %s38_s14, 2  ;;  %s217_s11 = int_to_ptr.hbm [resolvable:$true] %s216_s11 }
  0x16   : > { %791 = dma.vmem_to_smem (!%p1170_p6), %s237_s29, 16, %s1076_s19, [#allocation10]  }
  0x17   : > { %785 = dma.hbm_to_smem (!%p1170_p6), %s217_s11, 16, %s1077_s20, [#allocation5]  }
  0x18   : > { %788 = dma.vmem_to_smem (!%p1170_p6), %s227_s15, 16, %s1078_s27, [#allocation6]  }
  0x19   : > { %794 = dma.vmem_to_smem (!%p1170_p6), %s247_s18, 16, %s1079_s28, [#allocation10]  }
  0x1a   : > { %s256_s29 = sshll.u32 %s1398_s5, 4  ;;  %s684_s11 = sadd.s32 4294967294, %s1074_s26   ;;  %s257_s29 = int_to_ptr.vmem [resolvable:$true] %s256_s29 }
  0x1b   : > { %797 = dma.vmem_to_smem (!%p1170_p6), %s257_s29, 16, %s1080_s13, [#allocation13]  }
  0x1c   : > { %s47_s15 = sadd.s32 1, %s1062_s23  ;;  %p54_p8 = scmp.ne.s32.totalorder %s1062_s23, %s1058_s22 }
  0x1d   : > { %p55_p9 = scmp.eq.s32.totalorder %s1074_s26, 0  ;;  %p60_p10 = scmp.ne.s32.totalorder %s1058_s22, %s1054_s21 }
  0x1e   : > { %s1417_s14 = smov (%p40_p7, %s38_s14), 0  ;;  %p191_p13 = scmp.eq.s32.totalorder %s683_s30, 1 }
  0x1f   : > { %p1203_p11 = por %p55_p9, %p54_p8  ;;  %p1209_p12 = por %p1153_p1, %p60_p10 }
  0x20   : > { %s42_s17 = ssub.s32 %s1070_s25, %s1417_s14  ;;  %p197_p2 = scmp.eq.s32.totalorder %s684_s11, 1 }
  0x21   : > { %p45_p0 = scmp.eq.s32.totalorder %s42_s17, 0  ;;  %p1217_p5 = por %p191_p13, %p54_p8 }
  0x22   : > { %p811_p6 = scmp.lt.s32.totalorder %s1074_s26, 2  ;;  %p1225_p7 = por %p197_p2, %p60_p10 }
  0x23   : > { %s1223_s19 = scalar_select %p45_p0, %s1062_s23, %s47_s15  }
  0x24   : > { %s267_s27 = sand.u32 1, %s1062_s23   ;;  %s756_s9 = sshll.u32 %s1070_s25, 3 }
  0x25   : > { %s692_s28 = sshll.u32 %s267_s27, 3  ;;  %s278_s30 = scalar_lea.hbm %s1393_s0, %s756_s9 }
  0x26   : > { %s271_s13 = scalar_lea.vmem [#allocation2], %s692_s28  ;;  %s280_s17 = sshll.u32 %s278_s30, 4  ;;  %s281_s17 = int_to_ptr.hbm [resolvable:$true] %s280_s17 }
  0x27   : > { %s282_s11 = sshll.u32 %s271_s13, 4  ;;  %p799_p8 = pnand %p811_p6, %p1203_p11  ;;  %s283_s11 = int_to_ptr.vmem [resolvable:$true] %s282_s11 }
  0x28   : > { %s268_s15 = scalar_lea.sflag [#allocation3], %s267_s27  ;;  %291 = sbr.rel (%p1158_p3) target bundleno = 112 (0x70), region = 44 }
  0x29   : > { %801 = dma.hbm_to_vmem [thread:$0]  (!%p799_p8), %s281_s17, 128, %s283_s11, %s268_s15  }
  0x2a   : > { %s1239_s1 = sand.u32 (!%p1158_p3), 1, %s1058_s22  }
  0x2b   : > { %s696_s9 = sshll.u32 (!%p1158_p3), %s1239_s1, 3  ;;  %s294_s28 = scalar_lea.sflag (!%p1158_p3), [#allocation3], %s1239_s1 }
  0x2c   : > { %s1245_s10 = scalar_lea.vmem (!%p1158_p3), [#allocation2], %s696_s9 }
  0x2d   : > { %1029 = dma.done.wait (%p1209_p12), %s294_s28, 128  }
  0x2e   : > { %1031 = vsyncadd (%p1209_p12), %s294_s28, 4294967168 }
  0x2f   : > { %1033 = dma.done.wait (%p1153_p1), [#allocation5], 16  }
  0x30   : > { %1035 = vsyncadd (%p1153_p1), [#allocation5], 4294967280 }
  0x31   : > { %1037 = dma.done.wait (%p1153_p1), [#allocation6], 16  }
  0x32   : > { %1039 = vsyncadd (%p1153_p1), [#allocation6], 4294967280 }
  0x33   : > { %1041 = dma.done.wait (%p1153_p1), [#allocation10], 32  }
  0x34   : > { %1043 = vsyncadd (%p1153_p1), [#allocation10], 4294967264 }
  0x35   : > { %1045 = dma.done.wait (%p1153_p1), [#allocation13], 16  }
  0x36   : > { %1047 = vsyncadd (%p1153_p1), [#allocation13], 4294967280 }
  0x37   : > { %328 = sfence }
  0x38   : > { %s355_s8 = sld [smem:[#allocation8]]  ;;  %v356_v0 = vld [vmem:[%s1245_s10] ss:$4 sm:$0x3]  ;;  %v426_v54 = vlaneseq }
  0x39   : > { %s703_s16 = sld [smem:[#allocation8 + $0x1]]  ;;  %v704_v1 = vld [vmem:[%s1245_s10 + $0x1] ss:$4 sm:$0x3] }
  0x3a   : > { %s705_s12 = sld [smem:[#allocation8 + $0x2]]  ;;  %v706_v3 = vld [vmem:[%s1245_s10 + $0x2] ss:$4 sm:$0x3]  ;;  %vm1310_vm0 = vcmp.lt.s32.totalorder %v426_v54, 256 }
  0x3b   : > { %s707_s27 = sld [smem:[#allocation8 + $0x3]]  ;;  %v708_v6 = vld [vmem:[%s1245_s10 + $0x3] ss:$4 sm:$0x3] }
  0x3c   : > { %s1268_s29 = sld [smem:[#allocation11]]  ;;  %v432_v41 = vld [vmem:[%s1245_s10] ss:$4 sm:$0x3] }
  0x3d   : > { %s709_s30 = sld [smem:[#allocation8 + $0x4]]  ;;  %v720_v45 = vld [vmem:[%s1245_s10 + $0x1] ss:$4 sm:$0x3] }
  0x3e   : > { %v357_v2 = vstv %s355_s8  ;;  %s710_s13 = sld [smem:[#allocation8 + $0x5]]  ;;  %v722_v48 = vld [vmem:[%s1245_s10 + $0x2] ss:$4 sm:$0x3] }
  0x3f   : > { %v358_v4 = vmul.f32 %v357_v2, %v356_v0  ;;  %v362_v5 = vstv %s703_s16  ;;  %s711_s7 = sld [smem:[#allocation8 + $0x6]]  ;;  %v724_v52 = vld [vmem:[%s1245_s10 + $0x3] ss:$4 sm:$0x3] }
  0x40   : > { %v363_v7 = vmul.f32 %v704_v1, %v362_v5  ;;  %v368_v8 = vstv %s705_s12  ;;  %s712_s11 = sld [smem:[#allocation8 + $0x7]]  ;;  %v464_v2 = vld [vmem:[%s1245_s10] ss:$4 sm:$0x3] }
  0x41   : > { %v369_v9 = vmul.f32 %v706_v3, %v368_v8  ;;  %v374_v10 = vstv %s707_s27  ;;  %s1273_s17 = sld [smem:[#allocation11 + $0x1]] }
  0x42   : > { %v364_v11 = vadd.f32 %v363_v7, %v358_v4  ;;  %v375_v12 = vmul.f32 %v708_v6, %v374_v10  ;;  %s400_s15 = sld [smem:[#allocation7]]  ;;  %v378_v17 = vstv %s1268_s29 }
  0x43   : > { %v382_v13 = vstv %s709_s30  ;;  %s714_s28 = sld [smem:[#allocation7 + $0x1]] }
  0x44   : > { %v370_v14 = vadd.f32 %v369_v9, %v364_v11  ;;  %v383_v15 = vmul.f32 %v382_v13, %v356_v0  ;;  %v385_v16 = vstv %s710_s13  ;;  %s715_s8 = sld [smem:[#allocation7 + $0x2]]  ;;  %v733_v9 = vld [vmem:[%s1245_s10 + $0x2] ss:$4 sm:$0x3] }
  0x45   : > { %v386_v18 = vmul.f32 %v704_v1, %v385_v16  ;;  %v389_v19 = vstv %s711_s7  ;;  %s716_s16 = sld [smem:[#allocation7 + $0x3]] }
  0x46   : > { %v376_v20 = vadd.f32 %v375_v12, %v370_v14  ;;  %v390_v21 = vmul.f32 %v706_v3, %v389_v19  ;;  %v393_v22 = vstv %s712_s11  ;;  %s415_s12 = sld [smem:[#allocation9]]  ;;  %v735_v14 = vld [vmem:[%s1245_s10 + $0x3] ss:$4 sm:$0x3] }
  0x47   : > { %v387_v23 = vadd.f32 %v386_v18, %v383_v15  ;;  %v394_v24 = vmul.f32 %v708_v6, %v393_v22  ;;  %s1276_s27 = sld [smem:[#allocation9 + $0x1]]  ;;  %v397_v31 = vstv %s1273_s17 }
  0x48   : > { %v379_v25 = vadd.f32 %v378_v17, %v376_v20  ;;  %v401_v26 = vstv %s400_s15  ;;  %s1278_s30 = sld [smem:[#allocation12]] }
  0x49   : > { %v391_v27 = vadd.f32 %v390_v21, %v387_v23  ;;  %v402_v28 = vmul.f32 %v401_v26, %v356_v0  ;;  %v404_v29 = vstv %s714_s28  ;;  %s718_s29 = sld [smem:[#allocation7 + $0x4]]  ;;  %v496_v26 = vld [vmem:[%s1245_s10] ss:$4 sm:$0x3] }
  0x4a   : > { %v1280_v30 = vmax.f32 %v379_v25, 0.0  ;;  %v405_v32 = vmul.f32 %v704_v1, %v404_v29  ;;  %v408_v33 = vstv %s715_s8  ;;  %s719_s13 = sld [smem:[#allocation7 + $0x5]]  ;;  %v742_v29 = vld [vmem:[%s1245_s10 + $0x1] ss:$4 sm:$0x3] }
  0x4b   : > { %v395_v34 = vadd.f32 %v394_v24, %v391_v27  ;;  %v409_v35 = vmul.f32 %v706_v3, %v408_v33  ;;  %v412_v36 = vstv %s716_s16  ;;  %s721_s7 = sld [smem:[#allocation7 + $0x6]]  ;;  %v744_v33 = vld [vmem:[%s1245_s10 + $0x2] ss:$4 sm:$0x3] }
  0x4c   : > { %v406_v37 = vadd.f32 %v405_v32, %v402_v28  ;;  %v413_v38 = vmul.f32 %v708_v6, %v412_v36  ;;  %v416_v39 = vstv %s415_s12  ;;  %s723_s11 = sld [smem:[#allocation7 + $0x7]]  ;;  %v731_v6 = vld [vmem:[%s1245_s10 + $0x1] ss:$4 sm:$0x3] }
  0x4d   : > { %v398_v40 = vadd.f32 %v397_v31, %v395_v34  ;;  %s1284_s15 = sld [smem:[#allocation9 + $0x2]]  ;;  %v417_v43 = vmul.f32 %v416_v39, %v1280_v30  ;;  %v420_v44 = vstv %s1276_s27 }
  0x4e   : > { %v410_v42 = vadd.f32 %v409_v35, %v406_v37  ;;  %s1289_s17 = sld [smem:[#allocation9 + $0x3]]  ;;  %v424_v60 = vstv %s1278_s30 }
  0x4f   : > { %v1291_v46 = vmax.f32 %v398_v40, 0.0  ;;  %v433_v47 = vstv %s718_s29  ;;  %s1294_s28 = sld [smem:[#allocation12 + $0x1]] }
  0x50   : > { %v414_v49 = vadd.f32 %v413_v38, %v410_v42  ;;  %v434_v50 = vmul.f32 %v433_v47, %v432_v41  ;;  %v437_v51 = vstv %s719_s13  ;;  %s729_s8 = sld [smem:[#allocation7 + $0x8]]  ;;  %v746_v38 = vld [vmem:[%s1245_s10 + $0x3] ss:$4 sm:$0x3] }
  0x51   : > { %v421_v53 = vmul.f32 %v420_v44, %v1291_v46  ;;  %v438_v55 = vmul.f32 %v720_v45, %v437_v51  ;;  %v442_v56 = vstv %s721_s7  ;;  %s1298_s16 = sld [smem:[#allocation7 + $0x9]] }
  0x52   : > { %v418_v57 = vadd.f32 %v417_v43, %v414_v49  ;;  %v443_v58 = vmul.f32 %v722_v48, %v442_v56  ;;  %v447_v59 = vstv %s723_s11  ;;  %s1300_s12 = sld [smem:[#allocation7 + $0xa]]  ;;  %s1326_s11 = scalar_lea.vmem [#allocation14], %s696_s9 }
  0x53   : > { %v439_v61 = vadd.f32 %v438_v55, %v434_v50  ;;  %v448_v62 = vmul.f32 %v724_v52, %v447_v59  ;;  %v451_v63 = vstv %s1284_s15  ;;  %s1304_s27 = sld [smem:[#allocation7 + $0xb]] }
  0x54   : > { %v422_v0 = vadd.f32 %v421_v53, %v418_v57  ;;  %v455_v1 = vstv %s1289_s17  ;;  %s1308_s29 = sld [smem:[#allocation9 + $0x4]]  ;;  %v452_v5 = vmul.f32 %v451_v63, %v1280_v30 }
  0x55   : > { %v444_v4 = vadd.f32 %v443_v58, %v439_v61  ;;  %s1316_s30 = sld [smem:[#allocation9 + $0x5]]  ;;  %v456_v11 = vmul.f32 %v455_v1, %v1291_v46  ;;  %v459_v20 = vstv %s1294_s28 }
  0x56   : > { %v425_v7 = vadd.f32 %v424_v60, %v422_v0  ;;  %v465_v8 = vstv %s729_s8  ;;  %s1319_s13 = sld [smem:[#allocation12 + $0x2]] }
  0x57   : > { %v449_v10 = vadd.f32 %v448_v62, %v444_v4  ;;  %v466_v12 = vmul.f32 %v465_v8, %v464_v2  ;;  %v469_v13 = vstv %s1298_s16  ;;  %s740_s7 = sld [smem:[#allocation7 + $0xc]] }
  0x58   : > { %430 = vst.msk [vmem:[%s1326_s11] ss:$4 sm:$0x3] %vm1310_vm0, %v425_v7  ;;  %v470_v15 = vmul.f32 %v731_v6, %v469_v13  ;;  %v474_v16 = vstv %s1300_s12  ;;  %s741_s15 = sld [smem:[#allocation7 + $0xd]]  ;;  %s757_s12 = sshll.u32 %s1066_s24, 3 }
  0x59   : > { %v453_v17 = vadd.f32 %v452_v5, %v449_v10  ;;  %v475_v18 = vmul.f32 %v733_v9, %v474_v16  ;;  %v479_v19 = vstv %s1304_s27  ;;  %s743_s17 = sld [smem:[#allocation7 + $0xe]]  ;;  %s543_s24 = sshll.u32 %s1326_s11, 4  ;;  %s544_s24 = int_to_ptr.vmem [resolvable:$true] %s543_s24 }
  0x5a   : > { %v471_v21 = vadd.f32 %v470_v15, %v466_v12  ;;  %v480_v22 = vmul.f32 %v735_v14, %v479_v19  ;;  %v483_v23 = vstv %s1308_s29  ;;  %s745_s9 = sld [smem:[#allocation7 + $0xf]]  ;;  %s541_s29 = scalar_lea.hbm %s1399_s6, %s757_s12 }
  0x5b   : > { %v457_v24 = vadd.f32 %v456_v11, %v453_v17  ;;  %v487_v25 = vstv %s1316_s30  ;;  %s747_s8 = sld [smem:[#allocation9 + $0x6]]  ;;  %v484_v28 = vmul.f32 %v483_v23, %v1280_v30  ;;  %s545_s30 = sshll.u32 %s541_s29, 4  ;;  %s546_s30 = int_to_ptr.hbm [resolvable:$true] %s545_s30 }
  0x5c   : > { %v476_v27 = vadd.f32 %v475_v18, %v471_v21  ;;  %s748_s16 = sld [smem:[#allocation9 + $0x7]]  ;;  %v488_v35 = vmul.f32 %v487_v25, %v1291_v46  ;;  %v491_v44 = vstv %s1319_s13  ;;  %s528_s13 = scalar_lea.sflag [#allocation4], %s1239_s1 }
  0x5d   : > { %v460_v31 = vadd.f32 %v459_v20, %v457_v24  ;;  %v497_v32 = vstv %s740_s7  ;;  %s749_s28 = sld [smem:[#allocation12 + $0x3]]  ;;  %s990_s7 = sshra.s32 %s546_s30, 4  ;;  %s991_s7 = int_to_ptr.hbm [resolvable:$true] %s990_s7 }
  0x5e   : > { %v481_v34 = vadd.f32 %v480_v22, %v476_v27  ;;  %v498_v36 = vmul.f32 %v497_v32, %v496_v26  ;;  %v501_v37 = vstv %s741_s15  ;;  %s992_s15 = scalar_lea.hbm %s991_s7, 8  ;;  %p997_p10 = scmp.lt.s32.totalorder %s991_s7, %s1399_s6 }
  0x5f   : > { %728 = vst.msk [vmem:[%s1326_s11 + $0x1] ss:$4 sm:$0x3] %vm1310_vm0, %v460_v31  ;;  %v502_v39 = vmul.f32 %v742_v29, %v501_v37  ;;  %v506_v40 = vstv %s743_s17  ;;  %p993_p1 = scmp.ne.s32.totalorder %s991_s7, %s992_s15 }
  0x60   : > { %v485_v41 = vadd.f32 %v484_v28, %v481_v34  ;;  %v507_v42 = vmul.f32 %v744_v33, %v506_v40  ;;  %v511_v43 = vstv %s745_s9 }
  0x61   : > { %v503_v45 = vadd.f32 %v502_v39, %v498_v36  ;;  %v512_v47 = vmul.f32 %v746_v38, %v511_v43  ;;  %v515_v48 = vstv %s747_s8  ;;  %p994_p3 = pnand %p993_p1, %p1217_p5  ;;  %s996_s8 = scalar_lea.hbm %s1399_s6, 16 }
  0x62   : > { %v489_v49 = vadd.f32 %v488_v35, %v485_v41  ;;  %v519_v50 = vstv %s748_s16  ;;  %v516_v52 = vmul.f32 %v515_v48, %v1280_v30  ;;  %p998_p11 = scmp.lt.s32.totalorder %s996_s8, %s992_s15 }
  0x63   : > { %v508_v51 = vadd.f32 %v507_v42, %v503_v45  ;;  %v520_v55 = vmul.f32 %v519_v50, %v1291_v46  ;;  %v523_v57 = vstv %s749_s28  ;;  %p995_p9 = pneg %p994_p3 }
  0x64   : > { %v492_v53 = vadd.f32 %v491_v44, %v489_v49  ;;  %p999_p12 = por %p998_p11, %p997_p10 }
  0x65   : > { %v513_v54 = vadd.f32 %v512_v47, %v508_v51 }
  0x66   : > { %739 = vst.msk [vmem:[%s1326_s11 + $0x2] ss:$4 sm:$0x3] %vm1310_vm0, %v492_v53  ;;  %p1000_p13 = pnand %p999_p12, %p995_p9 }
  0x67   : > { %v517_v56 = vadd.f32 %v516_v52, %v513_v54 }
  0x69   : > { %v521_v58 = vadd.f32 %v520_v55, %v517_v56 }
  0x6b   : > { %v524_v59 = vadd.f32 %v523_v57, %v521_v58 }
  0x6d   : > { %750 = vst.msk [vmem:[%s1326_s11 + $0x3] ss:$4 sm:$0x3] %vm1310_vm0, %v524_v59 }
  0x6e   : > { %1003 = shalt.err (!%p1000_p13)
}
  0x6f   : > { %780 = dma.vmem_to_hbm [thread:$0]  (%p1217_p5), %s544_s24, 128, %s546_s30, %s528_s13  }
  0x70 PF: > { %s557_s1 = sand.u32 1, %s1054_s21   ;;  %p803_p0 = pnand %p691_p4, %p1225_p7 }
  0x71   : > { %s558_s11 = scalar_lea.sflag [#allocation4], %s557_s1 }
  0x72   : > { %p804_p2 = pneg %p803_p0 }
  0x74   : > { %1049 = dma.done.wait (%p804_p2), %s558_s11, 128  }
  0x75   : > { %1051 = vsyncadd (%p804_p2), %s558_s11, 4294967168  ;;  %s26_s26 = sadd.s32 1, %s1074_s26   ;;  %s1411_s21 = smov %s1058_s22 }
  0x76   : > { %p23_p6 = scmp.ge.s32.totalorder %s26_s26, 4   ;;  %s1412_s22 = smov %s1062_s23 }
  0x77   : > { %s1413_s23 = smov %s1223_s19  ;;  %s1414_s24 = smov %s1070_s25 }
  0x78   : > { %s1415_s25 = smov %s1417_s14  ;;  %25 = sbr.rel (!%p23_p6) target bundleno = 12 (0xc), region = 117 }
  0x7d   :  { %564 = vsyncpa [#allocation3], 1 }
  0x7e   :  { %566 = vsyncpa [#allocation3 + $0x1], 1 }
  0x7f   :  { %567 = vsyncpa [#allocation4], 1 }
  0x80   :  { %569 = vsyncpa [#allocation4 + $0x1], 1 }
  0x81   :  { %570 = vsyncpa [#allocation5], 1 }
  0x82   :  { %572 = vsyncpa [#allocation5 + $0x1], 1 }
  0x83   :  { %573 = vsyncpa [#allocation6], 1 }
  0x84   :  { %575 = vsyncpa [#allocation6 + $0x1], 1 }
  0x85   :  { %576 = vsyncpa [#allocation10], 1 }
  0x86   :  { %577 = vsyncpa [#allocation13], 1 }

</bundles_post_ra>
